<compile_context>
chip_gen: v6e
topology: v6e:2x2x1
jax: 0.10.0
libtpu: 0.0.40
codegen_flags: <defaults>
</compile_context>

<pallas_src>
import functools

import jax
import jax.numpy as jnp
from jax.experimental import pallas as pl
from jax.experimental.pallas import tpu as pltpu


def _round_up(x, m):
    return ((x + m - 1) // m) * m


def sage_layer_kernel(adj_ref, h_src_ref, h_self_ref, w_cat_ref, b_ref,
                      gamma_ref, beta_ref, out_ref, acc_ref, *,
                      apply_relu, dim_embed, ones_col):
    """One SAGEConv('mean') layer + (relu) + LayerNorm.

    Grid = (dst_tiles [parallel], src_reduction_tiles [arbitrary]).
    acc_ref accumulates A_tile @ [H_tile | 1] in f32 across the reduction axis;
    the ones_col column of the accumulator is the per-row degree.
    """
    k = pl.program_id(1)

    @pl.when(k == 0)
    def _():
        acc_ref[...] = jnp.zeros_like(acc_ref)

    # bf16 x bf16 -> f32 accumulate on the MXU.
    acc_ref[...] += jnp.dot(adj_ref[...], h_src_ref[...],
                            preferred_element_type=jnp.float32)

    @pl.when(k == pl.num_programs(1) - 1)
    def _():
        acc = acc_ref[...]                                   # (tm, dip) f32
        deg = acc[:, ones_col:ones_col + 1]                  # (tm, 1) degrees
        inv_deg = pl.reciprocal(jnp.maximum(deg, 1.0), approx=True)
        h_neigh = (acc * inv_deg).astype(jnp.bfloat16)       # mean aggregation

        # Fused self+neighbor projection: [h_self | h_neigh] @ [W_self ; W_neigh].
        h_cat = jnp.concatenate([h_self_ref[...], h_neigh], axis=-1)  # (tm, 2*dip) bf16
        rst = jnp.dot(h_cat, w_cat_ref[...],
                      preferred_element_type=jnp.float32) + b_ref[...]

        if apply_relu:
            rst = jnp.maximum(rst, 0.0)   # F.relu(dropout(h)); dropout = identity (eval)

        # LayerNorm over the *real* feature dim (padded columns are exactly zero
        # by construction -> they don't perturb the sum; mask them out of the
        # variance). Epilogue stays f32.
        inv_d = 1.0 / dim_embed
        mean = jnp.sum(rst, axis=-1, keepdims=True) * inv_d
        col = jax.lax.broadcasted_iota(jnp.int32, rst.shape, 1)
        centered = jnp.where(col < dim_embed, rst - mean, 0.0)
        var = jnp.sum(centered * centered, axis=-1, keepdims=True) * inv_d
        inv = jax.lax.rsqrt(var + 1e-5)
        out = centered * inv * gamma_ref[...] + beta_ref[...]

        out_ref[...] = out.astype(out_ref.dtype)


def sage_layer(adj, h_src, w_self, w_neigh, bias, gamma, beta, *,
               apply_relu, out_dtype=jnp.float32, tm=256, tk=512):
    """One tiled SAGE layer. adj: (num_dst, num_src); h_src: (num_src, dim_in)."""
    num_dst, num_src = adj.shape
    dim_in = h_src.shape[1]
    dim_embed = w_self.shape[1]

    # Lane-dense padded feature dims; reserve one extra input column for the
    # implicit ones-vector (degree fused into the aggregation matmul).
    dip = _round_up(dim_in + 1, 128)
    dp = _round_up(dim_embed, 128)
    ones_col = dip - 1

    # Tile sizes (clamped for small graphs; tm multiple of 16 for bf16 sublane
    # packing, tk multiple of 128 for lane alignment).
    tm = min(tm, _round_up(num_dst, 16))
    tk = min(tk, _round_up(num_src, 128))
    num_dst_pad = _round_up(num_dst, tm)
    num_src_pad = _round_up(max(num_src, num_dst_pad), tk)

    # --- pad operands (zeros don't perturb sums; adjacency 0/1 is exact in bf16) ---
    adj_p = jnp.zeros((num_dst_pad, num_src_pad), jnp.bfloat16)
    adj_p = adj_p.at[:num_dst, :num_src].set(adj.astype(jnp.bfloat16))

    h_p = jnp.zeros((num_src_pad, dip), jnp.bfloat16)
    h_p = h_p.at[:num_src, :dim_in].set(h_src.astype(jnp.bfloat16))
    h_p = h_p.at[:num_src, ones_col].set(1.0)                 # ones column -> degree

    def pad_w(w):
        wp = jnp.zeros((dip, dp), jnp.bfloat16)
        return wp.at[:dim_in, :dim_embed].set(w.astype(jnp.bfloat16))

    w_cat = jnp.concatenate([pad_w(w_self), pad_w(w_neigh)], axis=0)   # (2*dip, dp)

    def pad_vec(v):
        vp = jnp.zeros((1, dp), jnp.float32)
        return vp.at[:, :dim_embed].set(v.reshape(1, -1).astype(jnp.float32))

    b_p, g_p, be_p = pad_vec(bias), pad_vec(gamma), pad_vec(beta)

    grid = (num_dst_pad // tm, num_src_pad // tk)
    kernel = functools.partial(sage_layer_kernel, apply_relu=apply_relu,
                               dim_embed=dim_embed, ones_col=ones_col)

    out_p = pl.pallas_call(
        kernel,
        out_shape=jax.ShapeDtypeStruct((num_dst_pad, dp), out_dtype),
        grid=grid,
        in_specs=[
            pl.BlockSpec((tm, tk), lambda i, k: (i, k)),        # adjacency tile
            pl.BlockSpec((tk, dip), lambda i, k: (k, 0)),       # H_src reduction tile
            pl.BlockSpec((tm, dip), lambda i, k: (i, 0)),       # H_self dst tile (same array)
            pl.BlockSpec((2 * dip, dp), lambda i, k: (0, 0)),   # fused [W_self; W_neigh]
            pl.BlockSpec((1, dp), lambda i, k: (0, 0)),         # bias
            pl.BlockSpec((1, dp), lambda i, k: (0, 0)),         # layernorm gamma
            pl.BlockSpec((1, dp), lambda i, k: (0, 0)),         # layernorm beta
        ],
        out_specs=pl.BlockSpec((tm, dp), lambda i, k: (i, 0)),
        scratch_shapes=[pltpu.VMEM((tm, dip), jnp.float32)],
        compiler_params=pltpu.CompilerParams(
            dimension_semantics=("parallel", "arbitrary"),
            vmem_limit_bytes=32 * 1024 * 1024),
    )(adj_p, h_p, h_p, w_cat, b_p, g_p, be_p)

    return out_p[:num_dst, :dim_embed]


def sage_forward(adjs, h0, params):
    """Multi-layer SAGE forward over a list of dense MFG adjacencies.

    adjs[l]: (num_dst_l, num_src_l); num_src_{l+1} == num_dst_l (DGL block convention).
    h0: (num_src_0, dim_node) input node features.
    """
    num_layers = len(adjs)
    h = h0
    for l in range(num_layers):
        w_self, w_neigh, bias, gamma, beta = params[l]
        last = (l == num_layers - 1)
        h = sage_layer(adjs[l], h, w_self, w_neigh, bias, gamma, beta,
                       apply_relu=not last,
                       out_dtype=jnp.float32 if last else jnp.bfloat16)
    return h


def make_params(key, dim_node, dim_embed, num_layers):
    params = []
    for l in range(num_layers):
        dim_in = dim_node if l == 0 else dim_embed
        key, k1, k2 = jax.random.split(key, 3)
        w_self = jax.random.normal(k1, (dim_in, dim_embed), jnp.float32) * 0.1
        w_neigh = jax.random.normal(k2, (dim_in, dim_embed), jnp.float32) * 0.1
        bias = jnp.zeros((1, dim_embed), jnp.float32)
        gamma = jnp.ones((1, dim_embed), jnp.float32)
        beta = jnp.zeros((1, dim_embed), jnp.float32)
        params.append((w_self, w_neigh, bias, gamma, beta))
    return params


def sage_forward_ref(adjs, h0, params):
    """Pure-JAX f32 reference for validation."""
    h = h0
    num_layers = len(adjs)
    for l in range(num_layers):
        w_self, w_neigh, bias, gamma, beta = params[l]
        adj = adjs[l].astype(jnp.float32)
        num_dst = adj.shape[0]
        deg = jnp.maximum(jnp.sum(adj, axis=-1, keepdims=True), 1.0)
        h_neigh = (adj @ h) / deg
        rst = h[:num_dst] @ w_self + h_neigh @ w_neigh + bias
        if l != num_layers - 1:
            rst = jnp.maximum(rst, 0.0)
        mean = jnp.mean(rst, axis=-1, keepdims=True)
        var = jnp.mean((rst - mean) ** 2, axis=-1, keepdims=True)
        rst = (rst - mean) * jax.lax.rsqrt(var + 1e-5) * gamma + beta
        h = rst
    return h


if __name__ == "__main__":
    dim_node = 32
    dim_embed = 32
    num_layers = 2

    # Synthetic 2-layer message-flow graph (DGL-block style):
    #   layer 0: 64 src nodes -> 32 dst nodes
    #   layer 1: 32 src nodes -> 16 dst (target) nodes
    num_src0, num_dst0, num_dst1 = 64, 32, 16

    key = jax.random.PRNGKey(0)
    key, kf, ka0, ka1, kp = jax.random.split(key, 5)

    h0 = jax.random.normal(kf, (num_src0, dim_node), jnp.float32)
    adj0 = jax.random.bernoulli(ka0, 0.25, (num_dst0, num_src0)).astype(jnp.float32)
    adj1 = jax.random.bernoulli(ka1, 0.25, (num_dst1, num_dst0)).astype(jnp.float32)

    params = make_params(kp, dim_node, dim_embed, num_layers)

    out = sage_forward([adj0, adj1], h0, params)
    out = jax.block_until_ready(out)

    assert out.shape == (num_dst1, dim_embed)
    assert bool(jnp.all(jnp.isfinite(out)))

    # Sanity-check against a pure-JAX f32 reference (bf16 activations + approx
    # reciprocal -> loose tolerance).
    ref = sage_forward_ref([adj0, adj1], h0, params)
    assert bool(jnp.allclose(out, ref, atol=1e-1, rtol=1e-1)), (
        float(jnp.max(jnp.abs(out - ref))))

    print("KERNEL_OK")
</pallas_src>

<mosaic_0001>
module attributes {stable_mosaic.version = 11 : i64} {
  func.func @sage_layer_kernel(%arg0: i32, %arg1: i32, %arg2: memref<32x128xbf16, #tpu.memory_space<vmem>>, %arg3: memref<128x128xbf16, #tpu.memory_space<vmem>>, %arg4: memref<32x128xbf16, #tpu.memory_space<vmem>>, %arg5: memref<256x128xbf16, #tpu.memory_space<vmem>>, %arg6: memref<1x128xf32, #tpu.memory_space<vmem>>, %arg7: memref<1x128xf32, #tpu.memory_space<vmem>>, %arg8: memref<1x128xf32, #tpu.memory_space<vmem>>, %arg9: memref<32x128xbf16, #tpu.memory_space<vmem>>, %arg10: memref<32x128xf32, #tpu.memory_space<vmem>>) attributes {dimension_semantics = [#tpu.dimension_semantics<parallel>, #tpu.dimension_semantics<arbitrary>], iteration_bounds = array<i64: 1, 1>, scalar_prefetch = 0 : i64, scratch_operands = 1 : i64, tpu.core_type = #tpu.core_type<tc>, window_params = [{transform_indices = @transform_0, window_bounds = array<i64: 32, 128>}, {transform_indices = @transform_1, window_bounds = array<i64: 128, 128>}, {transform_indices = @transform_2, window_bounds = array<i64: 32, 128>}, {pipeline_mode = #tpu.pipeline_mode<synchronous>, transform_indices = @transform_3, window_bounds = array<i64: 256, 128>}, {pipeline_mode = #tpu.pipeline_mode<synchronous>, transform_indices = @transform_4, window_bounds = array<i64: 1, 128>}, {pipeline_mode = #tpu.pipeline_mode<synchronous>, transform_indices = @transform_5, window_bounds = array<i64: 1, 128>}, {pipeline_mode = #tpu.pipeline_mode<synchronous>, transform_indices = @transform_6, window_bounds = array<i64: 1, 128>}, {transform_indices = @transform_7, window_bounds = array<i64: 32, 128>}]} {
    %c0_i32 = arith.constant 0 : i32
    %0 = arith.cmpi eq, %arg1, %c0_i32 : i32
    %1 = arith.extui %0 : i1 to i32
    %c0_i32_0 = arith.constant 0 : i32
    %2 = arith.cmpi ne, %1, %c0_i32_0 : i32
    scf.if %2 {
      %cst_10 = arith.constant 0.000000e+00 : f32
      %12 = vector.broadcast %cst_10 : f32 to vector<32x128xf32>
      %c0_11 = arith.constant 0 : index
      %c0_12 = arith.constant 0 : index
      %13 = vector.load %arg10[%c0_11, %c0_12] : memref<32x128xf32, #tpu.memory_space<vmem>>, vector<32x128xf32>
      tpu.vector_store %arg10[%c0_11, %c0_12], %12 {strides = array<i32>} : memref<32x128xf32, #tpu.memory_space<vmem>>, vector<32x128xf32>,
    } else {
    }
    %c0 = arith.constant 0 : index
    %c0_1 = arith.constant 0 : index
    %3 = vector.load %arg10[%c0, %c0_1] : memref<32x128xf32, #tpu.memory_space<vmem>>, vector<32x128xf32>
    %c0_2 = arith.constant 0 : index
    %c0_3 = arith.constant 0 : index
    %4 = vector.load %arg2[%c0_2, %c0_3] : memref<32x128xbf16, #tpu.memory_space<vmem>>, vector<32x128xbf16>
    %c0_4 = arith.constant 0 : index
    %c0_5 = arith.constant 0 : index
    %5 = vector.load %arg3[%c0_4, %c0_5] : memref<128x128xbf16, #tpu.memory_space<vmem>>, vector<128x128xbf16>
    %cst = arith.constant dense<0.000000e+00> : vector<32x128xf32>
    %6 = tpu.matmul %4, %5, %cst {dimension_numbers = #tpu.dot_dimension_numbers<[1], [0], [0], [1], [0, 0, 1, 1], [], []>} : vector<32x128xbf16>, vector<128x128xbf16>, vector<32x128xf32> -> vector<32x128xf32>
    %7 = arith.addf %3, %6 : vector<32x128xf32>
    %c0_6 = arith.constant 0 : index
    %c0_7 = arith.constant 0 : index
    %8 = vector.load %arg10[%c0_6, %c0_7] : memref<32x128xf32, #tpu.memory_space<vmem>>, vector<32x128xf32>
    tpu.vector_store %arg10[%c0_6, %c0_7], %7 {strides = array<i32>} : memref<32x128xf32, #tpu.memory_space<vmem>>, vector<32x128xf32>,
    %c0_i32_8 = arith.constant 0 : i32
    %9 = arith.cmpi eq, %arg1, %c0_i32_8 : i32
    %10 = arith.extui %9 : i1 to i32
    %c0_i32_9 = arith.constant 0 : i32
    %11 = arith.cmpi ne, %10, %c0_i32_9 : i32
    scf.if %11 {
      %c0_10 = arith.constant 0 : index
      %c0_11 = arith.constant 0 : index
      %12 = vector.load %arg10[%c0_10, %c0_11] : memref<32x128xf32, #tpu.memory_space<vmem>>, vector<32x128xf32>
      %13 = vector.extract_strided_slice %12 {offsets = [0, 127], sizes = [32, 1], strides = [1, 1]} : vector<32x128xf32> to vector<32x1xf32>
      %cst_12 = arith.constant 1.000000e+00 : f32
      %14 = vector.broadcast %cst_12 : f32 to vector<32x1xf32>
      %15 = arith.maximumf %13, %14 : vector<32x1xf32>
      %16 = tpu.reciprocal %15 {approx = true} : vector<32x1xf32> -> vector<32x1xf32>
      %17 = vector.broadcast %16 : vector<32x1xf32> to vector<32x128xf32>
      %18 = arith.mulf %12, %17 : vector<32x128xf32>
      %19 = arith.truncf %18 : vector<32x128xf32> to vector<32x128xbf16>
      %c0_13 = arith.constant 0 : index
      %c0_14 = arith.constant 0 : index
      %20 = vector.load %arg4[%c0_13, %c0_14] : memref<32x128xbf16, #tpu.memory_space<vmem>>, vector<32x128xbf16>
      %21 = tpu.concatenate %20, %19 in 1 : vector<32x128xbf16>, vector<32x128xbf16> -> vector<32x256xbf16>
      %c0_15 = arith.constant 0 : index
      %c0_16 = arith.constant 0 : index
      %22 = vector.load %arg5[%c0_15, %c0_16] : memref<256x128xbf16, #tpu.memory_space<vmem>>, vector<256x128xbf16>
      %cst_17 = arith.constant dense<0.000000e+00> : vector<32x128xf32>
      %23 = tpu.matmul %21, %22, %cst_17 {dimension_numbers = #tpu.dot_dimension_numbers<[1], [0], [0], [1], [0, 0, 1, 1], [], []>} : vector<32x256xbf16>, vector<256x128xbf16>, vector<32x128xf32> -> vector<32x128xf32>
      %c0_18 = arith.constant 0 : index
      %c0_19 = arith.constant 0 : index
      %24 = vector.load %arg6[%c0_18, %c0_19] : memref<1x128xf32, #tpu.memory_space<vmem>>, vector<1x128xf32>
      %25 = vector.broadcast %24 : vector<1x128xf32> to vector<32x128xf32>
      %26 = arith.addf %23, %25 : vector<32x128xf32>
      %cst_20 = arith.constant 0.000000e+00 : f32
      %27 = vector.broadcast %cst_20 : f32 to vector<32x128xf32>
      %28 = arith.maximumf %26, %27 : vector<32x128xf32>
      %cst_21 = arith.constant dense<0.000000e+00> : vector<32xf32>
      %29 = vector.multi_reduction <add>, %28, %cst_21 [1] : vector<32x128xf32> to vector<32xf32>
      %30 = vector.shape_cast %29 : vector<32xf32> to vector<32x1xf32>
      %cst_22 = arith.constant 3.125000e-02 : f32
      %31 = vector.broadcast %cst_22 : f32 to vector<32x1xf32>
      %32 = arith.mulf %30, %31 : vector<32x1xf32>
      %33 = tpu.iota {dimensions = array<i32: 1>} : vector<32x128xi32>
      %c32_i32 = arith.constant 32 : i32
      %34 = vector.broadcast %c32_i32 : i32 to vector<32x128xi32>
      %35 = arith.cmpi slt, %33, %34 : vector<32x128xi32>
      %36 = vector.broadcast %32 : vector<32x1xf32> to vector<32x128xf32>
      %37 = arith.subf %28, %36 : vector<32x128xf32>
      %cst_23 = arith.constant 0.000000e+00 : f32
      %38 = vector.broadcast %cst_23 : f32 to vector<32x128xf32>
      %39 = arith.select %35, %37, %38 : vector<32x128xi1>, vector<32x128xf32>
      %40 = arith.mulf %39, %39 : vector<32x128xf32>
      %cst_24 = arith.constant dense<0.000000e+00> : vector<32xf32>
      %41 = vector.multi_reduction <add>, %40, %cst_24 [1] : vector<32x128xf32> to vector<32xf32>
      %42 = vector.shape_cast %41 : vector<32xf32> to vector<32x1xf32>
      %cst_25 = arith.constant 3.125000e-02 : f32
      %43 = vector.broadcast %cst_25 : f32 to vector<32x1xf32>
      %44 = arith.mulf %42, %43 : vector<32x1xf32>
      %cst_26 = arith.constant 9.99999974E-6 : f32
      %45 = vector.broadcast %cst_26 : f32 to vector<32x1xf32>
      %46 = arith.addf %44, %45 : vector<32x1xf32>
      %47 = math.rsqrt %46 : vector<32x1xf32>
      %48 = vector.broadcast %47 : vector<32x1xf32> to vector<32x128xf32>
      %49 = arith.mulf %39, %48 : vector<32x128xf32>
      %c0_27 = arith.constant 0 : index
      %c0_28 = arith.constant 0 : index
      %50 = vector.load %arg7[%c0_27, %c0_28] : memref<1x128xf32, #tpu.memory_space<vmem>>, vector<1x128xf32>
      %51 = vector.broadcast %50 : vector<1x128xf32> to vector<32x128xf32>
      %52 = arith.mulf %49, %51 : vector<32x128xf32>
      %c0_29 = arith.constant 0 : index
      %c0_30 = arith.constant 0 : index
      %53 = vector.load %arg8[%c0_29, %c0_30] : memref<1x128xf32, #tpu.memory_space<vmem>>, vector<1x128xf32>
      %54 = vector.broadcast %53 : vector<1x128xf32> to vector<32x128xf32>
      %55 = arith.addf %52, %54 : vector<32x128xf32>
      %56 = arith.truncf %55 : vector<32x128xf32> to vector<32x128xbf16>
      %c0_31 = arith.constant 0 : index
      %c0_32 = arith.constant 0 : index
      %57 = vector.load %arg9[%c0_31, %c0_32] : memref<32x128xbf16, #tpu.memory_space<vmem>>, vector<32x128xbf16>
      tpu.vector_store %arg9[%c0_31, %c0_32], %56 {strides = array<i32>} : memref<32x128xbf16, #tpu.memory_space<vmem>>, vector<32x128xbf16>,
    } else {
    }
    return
  }
  func.func @transform_0(%arg0: i32, %arg1: i32) -> (i32, i32) {
    %c0_i32 = arith.constant 0 : i32
    return %arg0, %arg1 : i32, i32
  }
  func.func @transform_1(%arg0: i32, %arg1: i32) -> (i32, i32) {
    %c0_i32 = arith.constant 0 : i32
    %c0_i32_0 = arith.constant 0 : i32
    return %arg1, %c0_i32 : i32, i32
  }
  func.func @transform_2(%arg0: i32, %arg1: i32) -> (i32, i32) {
    %c0_i32 = arith.constant 0 : i32
    %c0_i32_0 = arith.constant 0 : i32
    return %arg0, %c0_i32 : i32, i32
  }
  func.func @transform_3(%arg0: i32, %arg1: i32) -> (i32, i32) {
    %c0_i32 = arith.constant 0 : i32
    %c0_i32_0 = arith.constant 0 : i32
    %c0_i32_1 = arith.constant 0 : i32
    return %c0_i32, %c0_i32_0 : i32, i32
  }
  func.func @transform_4(%arg0: i32, %arg1: i32) -> (i32, i32) {
    %c0_i32 = arith.constant 0 : i32
    %c0_i32_0 = arith.constant 0 : i32
    %c0_i32_1 = arith.constant 0 : i32
    return %c0_i32, %c0_i32_0 : i32, i32
  }
  func.func @transform_5(%arg0: i32, %arg1: i32) -> (i32, i32) {
    %c0_i32 = arith.constant 0 : i32
    %c0_i32_0 = arith.constant 0 : i32
    %c0_i32_1 = arith.constant 0 : i32
    return %c0_i32, %c0_i32_0 : i32, i32
  }
  func.func @transform_6(%arg0: i32, %arg1: i32) -> (i32, i32) {
    %c0_i32 = arith.constant 0 : i32
    %c0_i32_0 = arith.constant 0 : i32
    %c0_i32_1 = arith.constant 0 : i32
    return %c0_i32, %c0_i32_0 : i32, i32
  }
  func.func @transform_7(%arg0: i32, %arg1: i32) -> (i32, i32) {
    %c0_i32 = arith.constant 0 : i32
    %c0_i32_0 = arith.constant 0 : i32
    return %arg0, %c0_i32 : i32, i32
  }
}

</mosaic_0001>

<bundles_post_ra>
// kernel: tpu_custom_call.1
= control target key start
LH: loop header
LB: loop body
LE: loop exit
PB: predicated region body
PF: predicated region fallthrough
CT: control target
= control target key end

     0   :  { %12 = vsyncpa [#allocation4], 0  ;;  %s950_s0 = inlined_call_operand.hbm [shape: bf16[32,128], index: 0, kind: input, shape index: {}]   ;;  %s951_s1 = inlined_call_operand.hbm [shape: bf16[128,128], index: 1, kind: input, shape index: {}]   ;;  %s952_s2 = inlined_call_operand.hbm [shape: bf16[128,128], index: 2, kind: input, shape index: {}]   ;;  %s953_s3 = inlined_call_operand.hbm [shape: bf16[256,128], index: 3, kind: input, shape index: {}]   ;;  %s954_s4 = inlined_call_operand.vmem [shape: f32[1,128], index: 4, kind: input, shape index: {}]   ;;  %s955_s5 = inlined_call_operand.vmem [shape: f32[1,128], index: 5, kind: input, shape index: {}]   ;;  %s956_s6 = inlined_call_operand.vmem [shape: f32[1,128], index: 6, kind: input, shape index: {}]   ;;  %s957_s7 = inlined_call_operand.hbm [shape: bf16[32,128], index: 7, kind: output, shape index: {}]  }
   0x1   :  { %13 = vsyncpa [#allocation7], 0 }
   0x2   :  { %14 = vsyncpa [#allocation10], 0 }
   0x3   :  { %15 = vsyncpa [#allocation5], 0  ;;  %s859_s24 = smov [#allocation6]   ;;  %s860_s26 = smov [#allocation3]  }
   0x4   :  { %s33_s25 = sshll.u32 %s859_s24, 4  ;;  %s21_s27 = sshll.u32 %s860_s26, 4  ;;  %s34_s25 = int_to_ptr.vmem [resolvable:$true] %s33_s25  ;;  %s22_s27 = int_to_ptr.vmem [resolvable:$true] %s21_s27 }
   0x5   :  { %s759_s28 = scalar_lea.vmem %s34_s25, 1024  ;;  %p764_p1 = scmp.lt.s32.totalorder %s34_s25, %s34_s25 }
   0x6   :  { %p760_p0 = scmp.ne.s32.totalorder %s34_s25, %s759_s28  ;;  %p765_p2 = scmp.lt.s32.totalorder %s759_s28, %s759_s28 }
   0x8   :  { %p766_p3 = por %p765_p2, %p764_p1 }
   0xa   :  { %p767_p4 = pnand %p766_p3, %p760_p0 }
   0xc   :  { %770 = shalt.err (!%p767_p4)
}
   0xd   :  { %s861_s29 = smov 64   ;;  %s862_s30 = smov 4  }
   0xe   :  { %39 = dma.hbm_to_vmem [thread:$0]  %s951_s1, 1024, %s34_s25, [#allocation7], %s861_s29, %s861_s29, %s862_s30  }
   0xf   :  { %s779_s10 = scalar_lea.vmem %s22_s27, 256  ;;  %p784_p6 = scmp.lt.s32.totalorder %s22_s27, %s22_s27 }
  0x10   :  { %p780_p5 = scmp.ne.s32.totalorder %s22_s27, %s779_s10  ;;  %p785_p7 = scmp.lt.s32.totalorder %s779_s10, %s779_s10 }
  0x12   :  { %p786_p8 = por %p785_p7, %p784_p6 }
  0x14   :  { %p787_p9 = pnand %p786_p8, %p780_p5 }
  0x16   :  { %790 = shalt.err (!%p787_p9)
}
  0x17   :  { %27 = dma.hbm_to_vmem [thread:$0]  %s950_s0, 256, %s22_s27, [#allocation4], %s861_s29, %s861_s29, %s862_s30  }
  0x18   :  { %s863_s13 = smov [#allocation8]   ;;  %s864_s15 = smov [#allocation9]  }
  0x19   :  { %s45_s14 = sshll.u32 %s863_s13, 4  ;;  %s57_s16 = sshll.u32 %s864_s15, 4  ;;  %s46_s14 = int_to_ptr.vmem [resolvable:$true] %s45_s14  ;;  %s58_s16 = int_to_ptr.vmem [resolvable:$true] %s57_s16 }
  0x1a   :  { %s799_s1 = scalar_lea.vmem %s46_s14, 256  ;;  %p804_p11 = scmp.lt.s32.totalorder %s46_s14, %s46_s14 }
  0x1b   :  { %p800_p10 = scmp.ne.s32.totalorder %s46_s14, %s799_s1  ;;  %p805_p12 = scmp.lt.s32.totalorder %s799_s1, %s799_s1 }
  0x1d   :  { %p806_p13 = por %p805_p12, %p804_p11 }
  0x1f   :  { %p807_p0 = pnand %p806_p13, %p800_p10 }
  0x21   :  { %810 = shalt.err (!%p807_p0)
}
  0x22   :  { %51 = dma.hbm_to_vmem [thread:$0]  %s952_s2, 256, %s46_s14, [#allocation7], %s861_s29, %s861_s29, %s862_s30  }
  0x23   :  { %s819_s0 = scalar_lea.vmem %s58_s16, 2048  ;;  %p824_p2 = scmp.lt.s32.totalorder %s58_s16, %s58_s16 }
  0x24   :  { %p820_p1 = scmp.ne.s32.totalorder %s58_s16, %s819_s0  ;;  %p825_p3 = scmp.lt.s32.totalorder %s819_s0, %s819_s0 }
  0x26   :  { %p826_p4 = por %p825_p3, %p824_p2 }
  0x28   :  { %p827_p5 = pnand %p826_p4, %p820_p1 }
  0x2a   :  { %830 = shalt.err (!%p827_p5)
}
  0x2b   :  { %63 = dma.hbm_to_vmem [thread:$0]  %s953_s3, 2048, %s58_s16, [#allocation10], %s861_s29, %s861_s29, %s862_s30  }
  0x2c   :  { %851 = dma.done.wait [#allocation4], 256  }
  0x2d   :  { %852 = vsyncadd [#allocation4], 4294967040 }
  0x2e   :  { %853 = dma.done.wait [#allocation7], 1280  }
  0x2f   :  { %854 = vsyncadd [#allocation7], 4294966016 }
  0x30   :  { %855 = dma.done.wait [#allocation10], 2048  }
  0x31   :  { %856 = vsyncadd [#allocation10], 4294965248  ;;  %v707_v0 = vld [vmem:[#allocation6 + $0x38] sm:$0xff]   ;;  %v708_v1 = vld [vmem:[#allocation6 + $0x30] sm:$0xff]   ;;  %v865_v10 = vmov 127   ;;  %s866_s24 = smov [#allocation11]  }
  0x32   :  { %677 = vmatprep.subr.bf16.mxu0 %v707_v0  ;;  %v709_v2 = vld [vmem:[#allocation6 + $0x28] sm:$0xff]   ;;  %v710_v3 = vld [vmem:[#allocation6 + $0x20] sm:$0xff]   ;;  %v715_v4 = vld [vmem:[#allocation3] sm:$0xff]   ;;  %706 = vset.pattern.permute.xlu1 %v865_v10 }
  0x33   :  { %678 = vmatpush3.bf16.msra.mxu0 %v707_v0  ;;  %v711_v5 = vld [vmem:[#allocation6 + $0x18] sm:$0xff]   ;;  %693 = vmatprep.mubr.bf16.mxu0 %v715_v4  ;;  %v712_v6 = vld [vmem:[#allocation6 + $0x10] sm:$0xff]   ;;  %v713_v7 = vld [vmem:[#allocation6 + $0x8] sm:$0xff]  }
  0x34   :  { %679 = vmatprep.subr.bf16.mxu0 %v708_v1  ;;  %v714_v8 = vld [vmem:[#allocation6] sm:$0xff]   ;;  %v716_v9 = vld [vmem:[#allocation3 + $0x8] sm:$0xff]   ;;  %705 = vset.pattern.permute.xlu0 %v865_v10  ;;  %v717_v11 = vld [vmem:[#allocation9 + $0x78] sm:$0xff]  }
  0x35   :  { %v718_v12 = vld [vmem:[#allocation9 + $0x38] sm:$0xff]   ;;  %v719_v13 = vld [vmem:[#allocation9 + $0x70] sm:$0xff]   ;;  %649 = vmatprep.subr.bf16.mxu1 %v717_v11  ;;  %v721_v15 = vld [vmem:[#allocation9 + $0x68] sm:$0xff]  }
  0x36   :  { %650 = vmatpush3.bf16.msra.mxu1 %v718_v12  ;;  %v720_v14 = vld [vmem:[#allocation9 + $0x30] sm:$0xff]   ;;  %v722_v16 = vld [vmem:[#allocation9 + $0x28] sm:$0xff]   ;;  %v723_v17 = vld [vmem:[#allocation9 + $0x60] sm:$0xff]  }
  0x37   :  { %680 = vmatpush3.bf16.msra.mxu0 %v708_v1  ;;  %651 = vmatprep.subr.bf16.mxu1 %v719_v13  ;;  %v724_v18 = vld [vmem:[#allocation9 + $0x20] sm:$0xff]   ;;  %v725_v19 = vld [vmem:[#allocation9 + $0x58] sm:$0xff]   ;;  %v727_v21 = vld [vmem:[#allocation9 + $0x50] sm:$0xff]  }
  0x38   :  { %681 = vmatprep.subr.bf16.mxu0 %v709_v2  ;;  %v726_v20 = vld [vmem:[#allocation9 + $0x18] sm:$0xff]   ;;  %v728_v30 = vld [vmem:[#allocation9 + $0x10] sm:$0xff]   ;;  %v729_v31 = vld [vmem:[#allocation9 + $0x48] sm:$0xff]  }
  0x39   :  { %v730_v32 = vld [vmem:[#allocation9 + $0x8] sm:$0xff]   ;;  %v731_v35 = vld [vmem:[#allocation9 + $0x40] sm:$0xff]   ;;  %v733_v46 = vld [vmem:[#allocation8] sm:$0xff]  }
  0x3a   :  { %652 = vmatpush3.bf16.msra.mxu1 %v720_v14  ;;  %v732_v36 = vld [vmem:[#allocation9] sm:$0xff]   ;;  %v734_v50 = vld [vmem:[#allocation8 + $0x8] sm:$0xff]  }
  0x3b   :  { %682 = vmatpush3.bf16.msra.mxu0 %v709_v2  ;;  %653 = vmatprep.subr.bf16.mxu1 %v721_v15  ;;  %v601_v53 = vld [vmem:[%s954_s4] ss:$0 sm:$0xff] }
  0x3c   :  { %683 = vmatprep.subr.bf16.mxu0 %v710_v3 }
  0x3e   :  { %654 = vmatpush3.bf16.msra.mxu1 %v722_v16 }
  0x3f   :  { %684 = vmatpush3.bf16.msra.mxu0 %v710_v3  ;;  %655 = vmatprep.subr.bf16.mxu1 %v723_v17 }
  0x40   :  { %685 = vmatprep.subr.bf16.mxu0 %v711_v5 }
  0x42   :  { %656 = vmatpush3.bf16.msra.mxu1 %v724_v18 }
  0x43   :  { %686 = vmatpush3.bf16.msra.mxu0 %v711_v5  ;;  %657 = vmatprep.subr.bf16.mxu1 %v725_v19 }
  0x44   :  { %687 = vmatprep.subr.bf16.mxu0 %v712_v6 }
  0x46   :  { %658 = vmatpush3.bf16.msra.mxu1 %v726_v20 }
  0x47   :  { %688 = vmatpush3.bf16.msra.mxu0 %v712_v6  ;;  %659 = vmatprep.subr.bf16.mxu1 %v727_v21 }
  0x48   :  { %689 = vmatprep.subr.bf16.mxu0 %v713_v7 }
  0x4a   :  { %660 = vmatpush3.bf16.msra.mxu1 %v728_v30 }
  0x4b   :  { %690 = vmatpush3.bf16.msra.mxu0 %v713_v7  ;;  %661 = vmatprep.subr.bf16.mxu1 %v729_v31 }
  0x4c   :  { %691 = vmatprep.subr.bf16.mxu0 %v714_v8 }
  0x4e   :  { %662 = vmatpush3.bf16.msra.mxu1 %v730_v32 }
  0x4f   :  { %692 = vmatpush3.bf16.msra.mxu0 %v714_v8  ;;  %663 = vmatprep.subr.bf16.mxu1 %v731_v35  ;;  %v489_v8 = vlaneseq }
  0x52   :  { %694 = vmatmul.mubr.bf16.vlgmr.msra.gmra.mxu0 %v716_v9  ;;  %664 = vmatpush3.bf16.msra.mxu1 %v732_v36  ;;  %v490_v9 = vand.u32 127, %v489_v8 }
  0x54   :  { %vm491_vm0 = vcmp.lt.s32.totalorder %v490_v9, 32 }
 0x112   :  { %v695_v22 = vpop.f32.mrf.mxu0 }
 0x113   :  { %v241_v23 = vmax.f32 %v695_v22, 1.0 }
 0x114   :  { %v209_v24 = vpop.f32.mrf.mxu0 }
 0x115   :  { %735 = vrcp.f32 %v241_v23  ;;  %v239_v25 = vmax.f32 %v209_v24, 1.0 }
 0x116   :  { %v696_v26 = vpop.f32.mrf.mxu0 }
 0x117   :  { %737 = vrcp.f32 %v239_v25  ;;  %v242_v27 = vmax.f32 %v696_v26, 1.0 }
 0x118   :  { %v212_v28 = vpop.f32.mrf.mxu0 }
 0x119   :  { %739 = vrcp.f32 %v242_v27  ;;  %v240_v29 = vmax.f32 %v212_v28, 1.0 }
 0x11b   :  { %741 = vrcp.f32 %v240_v29 }
 0x122   :  { %v736_v33 = vpop.eup %735 }
 0x123   :  { %259 = vperm.xlu1 %706, %v736_v33  }
 0x124   :  { %v738_v34 = vpop.eup %737 }
 0x125   :  { %249 = vperm.xlu0 %705, %v738_v34  }
 0x126   :  { %v740_v37 = vpop.eup %739 }
 0x127   :  { %264 = vperm.xlu1 %706, %v740_v37  }
 0x128   :  { %v742_v38 = vpop.eup %741 }
 0x129   :  { %254 = vperm.xlu0 %705, %v742_v38  }
 0x19e   :  { %v260_v39 = vpop.permute.xlu1 %259 }
 0x19f   :  { %v269_v47 = vmul.f32 %v695_v22, %v260_v39 }
 0x1a0   :  { %v250_v40 = vpop.permute.xlu0 %249 }
 0x1a1   :  { %v267_v43 = vmul.f32 %v250_v40, %v209_v24 }
 0x1a2   :  { %v265_v41 = vpop.permute.xlu1 %264 }
 0x1a3   :  { %v270_v44 = vmul.f32 %v696_v26, %v265_v41 }
 0x1a4   :  { %v255_v42 = vpop.permute.xlu0 %254 }
 0x1a5   :  { %v268_v45 = vmul.f32 %v255_v42, %v212_v28  ;;  %v272_v49 = vpack.c.bf16 %v270_v44, %v269_v47  ;;  %v618_v44 = vld [vmem:[%s955_s5] ss:$0 sm:$0xff]  ;;  %s575_s5 = sshll.u32 %s866_s24, 4  ;;  %s576_s5 = int_to_ptr.vmem [resolvable:$true] %s575_s5 }
 0x1a6   :  { %s831_s25 = scalar_lea.vmem %s576_s5, 256  ;;  %p836_p7 = scmp.lt.s32.totalorder %s576_s5, %s576_s5 }
 0x1a7   :  { %v271_v48 = vpack.c.bf16 %v268_v45, %v267_v43  ;;  %p832_p6 = scmp.ne.s32.totalorder %s576_s5, %s831_s25  ;;  %p837_p8 = scmp.lt.s32.totalorder %s831_s25, %s831_s25 }
 0x1a9   :  { %456 = vmatprep.mubr.bf16.mxu1 %v271_v48  ;;  %v619_v48 = vld [vmem:[%s956_s6] ss:$0 sm:$0xff]  ;;  %p838_p9 = por %p837_p8, %p836_p7 }
 0x1aa   :  { %457 = vmatmul.mubr.bf16.vlgmr.msra.gmra.mxu1 %v733_v46 }
 0x1ab   :  { %464 = vmatprep.mubr.bf16.mxu1 %v272_v49  ;;  %p839_p10 = pnand %p838_p9, %p832_p6 }
 0x1b2   :  { %465 = vmatmul.mubr.bf16.gmra.mxu1 %v734_v50 }
 0x26a   :  { %v665_v51 = vpop.f32.mrf.mxu1 }
 0x26c   :  { %v666_v52 = vpop.f32.mrf.mxu1 }
 0x26d   :  { %v667_v54 = vadd.f32 %v666_v52, %v665_v51 }
 0x26e   :  { %v668_v55 = vpop.f32.mrf.mxu1 }
 0x26f   :  { %v459_v56 = vadd.f32 %v667_v54, %v601_v53 }
 0x270   :  { %v669_v57 = vpop.f32.mrf.mxu1 }
 0x271   :  { %v670_v58 = vadd.f32 %v669_v57, %v668_v55  ;;  %v473_v59 = vmax.f32 %v459_v56, 0.0 }
 0x272   :  { %v671_v60 = vpop.f32.mrf.mxu1 }
 0x273   :  { %477 = vadd.xlane.f32.xlu0 %v473_v59  ;;  %v462_v61 = vadd.f32 %v670_v58, %v601_v53 }
 0x274   :  { %v672_v62 = vpop.f32.mrf.mxu1 }
 0x275   :  { %v673_v63 = vadd.f32 %v672_v62, %v671_v60  ;;  %v474_v0 = vmax.f32 %v462_v61, 0.0 }
 0x276   :  { %v674_v1 = vpop.f32.mrf.mxu1 }
 0x277   :  { %479 = vadd.xlane.f32.xlu1 %v474_v0  ;;  %v467_v2 = vadd.f32 %v673_v63, %v601_v53 }
 0x278   :  { %v675_v3 = vpop.f32.mrf.mxu1 }
 0x279   :  { %v676_v4 = vadd.f32 %v675_v3, %v674_v1  ;;  %v475_v5 = vmax.f32 %v467_v2, 0.0 }
 0x27b   :  { %481 = vadd.xlane.f32.xlu0 %v475_v5  ;;  %v470_v6 = vadd.f32 %v676_v4, %v601_v53 }
 0x27d   :  { %v476_v7 = vmax.f32 %v470_v6, 0.0 }
 0x27f   :  { %483 = vadd.xlane.f32.xlu0 %v476_v7 }
 0x2fc   :  { %v478_v10 = vpop.xlane.xlu0 %477 }
 0x2fd   :  { %v485_v11 = vmul.f32 0.03125, %v478_v10 }
 0x2ff   :  { %v492_v12 = vsub.f32 %v473_v59, %v485_v11 }
 0x300   :  { %v480_v13 = vpop.xlane.xlu1 %479 }
 0x301   :  { %v486_v14 = vmul.f32 0.03125, %v480_v13  ;;  %v496_v15 = vsel %vm491_vm0, %v492_v12, 0.0 }
 0x302   :  { %v500_v16 = vmul.f32 %v496_v15, %v496_v15 }
 0x303   :  { %v493_v17 = vsub.f32 %v474_v0, %v486_v14 }
 0x304   :  { %504 = vadd.xlane.f32.xlu1 %v500_v16  ;;  %v482_v18 = vpop.xlane.xlu0 %481 }
 0x305   :  { %v487_v19 = vmul.f32 0.03125, %v482_v18  ;;  %v497_v20 = vsel %vm491_vm0, %v493_v17, 0.0 }
 0x306   :  { %v501_v21 = vmul.f32 %v497_v20, %v497_v20 }
 0x307   :  { %v494_v22 = vsub.f32 %v475_v5, %v487_v19 }
 0x308   :  { %506 = vadd.xlane.f32.xlu0 %v501_v21  ;;  %v484_v23 = vpop.xlane.xlu0 %483 }
 0x309   :  { %v488_v24 = vmul.f32 0.03125, %v484_v23  ;;  %v498_v25 = vsel %vm491_vm0, %v494_v22, 0.0 }
 0x30a   :  { %v502_v26 = vmul.f32 %v498_v25, %v498_v25 }
 0x30b   :  { %v495_v27 = vsub.f32 %v476_v7, %v488_v24 }
 0x30c   :  { %508 = vadd.xlane.f32.xlu1 %v502_v26 }
 0x30d   :  { %v499_v28 = vsel %vm491_vm0, %v495_v27, 0.0 }
 0x30e   :  { %v503_v29 = vmul.f32 %v499_v28, %v499_v28 }
 0x310   :  { %510 = vadd.xlane.f32.xlu0 %v503_v29 }
 0x38d   :  { %v505_v30 = vpop.xlane.xlu1 %504 }
 0x38e   :  { %v512_v31 = vmul.f32 0.03125, %v505_v30 }
 0x390   :  { %v516_v32 = vadd.f32 1e-05, %v512_v31 }
 0x391   :  { %v507_v33 = vpop.xlane.xlu0 %506 }
 0x392   :  { %743 = vrsqrt.f32 %v516_v32  ;;  %v513_v34 = vmul.f32 0.03125, %v507_v33 }
 0x394   :  { %v517_v35 = vadd.f32 1e-05, %v513_v34 }
 0x395   :  { %v509_v36 = vpop.xlane.xlu1 %508 }
 0x396   :  { %745 = vrsqrt.f32 %v517_v35  ;;  %v514_v37 = vmul.f32 0.03125, %v509_v36 }
 0x398   :  { %v518_v38 = vadd.f32 1e-05, %v514_v37 }
 0x399   :  { %v511_v39 = vpop.xlane.xlu0 %510 }
 0x39a   :  { %747 = vrsqrt.f32 %v518_v38  ;;  %v515_v40 = vmul.f32 0.03125, %v511_v39 }
 0x39c   :  { %v519_v41 = vadd.f32 1e-05, %v515_v40 }
 0x39e   :  { %749 = vrsqrt.f32 %v519_v41 }
 0x39f   :  { %v744_v42 = vpop.eup %743 }
 0x3a0   :  { %v524_v43 = vmul.f32 %v744_v42, %v496_v15 }
 0x3a2   :  { %v535_v47 = vmul.f32 %v618_v44, %v524_v43 }
 0x3a3   :  { %v746_v45 = vpop.eup %745 }
 0x3a4   :  { %v525_v46 = vmul.f32 %v746_v45, %v497_v20  ;;  %v546_v52 = vadd.f32 %v619_v48, %v535_v47 }
 0x3a6   :  { %v536_v49 = vmul.f32 %v618_v44, %v525_v46 }
 0x3a7   :  { %v748_v50 = vpop.eup %747 }
 0x3a8   :  { %v526_v51 = vmul.f32 %v748_v50, %v498_v25  ;;  %v547_v53 = vadd.f32 %v619_v48, %v536_v49 }
 0x3aa   :  { %v631_v54 = vpack.c.bf16 %v547_v53, %v546_v52  ;;  %v537_v57 = vmul.f32 %v618_v44, %v526_v51 }
 0x3ab   :  { %v750_v55 = vpop.eup %749 }
 0x3ac   :  { %v527_v56 = vmul.f32 %v750_v55, %v499_v28  ;;  %632 = vst [vmem:[#allocation11] sm:$0xff] %v631_v54   ;;  %v548_v59 = vadd.f32 %v619_v48, %v537_v57 }
 0x3ae   :  { %v538_v58 = vmul.f32 %v618_v44, %v527_v56 }
 0x3b0   :  { %v549_v60 = vadd.f32 %v619_v48, %v538_v58 }
 0x3b2   :  { %v636_v61 = vpack.c.bf16 %v549_v60, %v548_v59 }
 0x3b4   :  { %638 = vst [vmem:[#allocation11 + $0x8] sm:$0xff] %v636_v61  }
 0x3b5   :  { %842 = shalt.err (!%p839_p10)
}
 0x3b6   :  { %581 = dma.vmem_to_hbm [thread:$0]  %s576_s5, 256, %s957_s7, [#allocation5], %s861_s29, %s861_s29, %s862_s30  }
 0x3b7   :  { %857 = dma.done.wait [#allocation5], 256  }
 0x3b8   :  { %858 = vsyncadd [#allocation5], 4294967040 }
 0x3b9   :  { %585 = vsyncpa [#allocation4], 1 }
 0x3ba   :  { %586 = vsyncpa [#allocation7], 1 }
 0x3bb   :  { %587 = vsyncpa [#allocation10], 1 }
 0x3bc   :  { %588 = vsyncpa [#allocation5], 1 }

</bundles_post_ra>
